<compile_context>
chip_gen: v6e
topology: v6e:2x2x1
jax: 0.10.0
libtpu: 0.0.40
codegen_flags: <defaults>
</compile_context>

<pallas_src>
import math
from functools import partial

import numpy as np
import jax
import jax.numpy as jnp
from jax import lax
from jax.experimental import pallas as pl
from jax.experimental.pallas import tpu as pltpu  # noqa: F401

# ---------------- config (small, consistent with the module) ----------------
CFG = dict(emb_dim=32, context_length=8, n_heads=4, drop_rate=0.0, qkv_bias=False)
B = 2
T = CFG["context_length"]
D = CFG["emb_dim"]
H = CFG["n_heads"]
HD = D // H
EPS = 1e-5
SQRT_2_OVER_PI = math.sqrt(2.0 / math.pi)


# ------------------------------- kernel -------------------------------------
def _layer_norm(x, scale, shift):
    mean = jnp.mean(x, axis=-1, keepdims=True)
    var = jnp.mean((x - mean) ** 2, axis=-1, keepdims=True)   # unbiased=False
    return scale * ((x - mean) * lax.rsqrt(var + EPS)) + shift


def _gelu(x):
    return 0.5 * x * (1.0 + jnp.tanh(SQRT_2_OVER_PI * (x + 0.044715 * x * x * x)))


def transformer_block_kernel(
    x_ref, mask_ref, w_in_ref, w2_ref, pvec_ref, out_ref,
    *, batch, seq_len, num_heads, head_dim, emb_dim,
):
    f32, bf16 = jnp.float32, jnp.bfloat16
    bt = batch * seq_len
    hidden = 4 * emb_dim

    x = x_ref[...].reshape(bt, emb_dim)              # fold batch into rows (layout-preserving)

    # ---- unpack consolidated parameter block (static slices, f32) ----
    pv = pvec_ref[...]                               # (8, 4D) f32
    n1s = pv[0:1, 0:emb_dim]
    n1b = pv[1:2, 0:emb_dim]
    n2s = pv[2:3, 0:emb_dim]
    n2b = pv[3:4, 0:emb_dim]
    bo = pv[4:5, 0:emb_dim]
    b2 = pv[5:6, 0:emb_dim]
    b1 = pv[6:7, 0:hidden]

    # ---- unpack fused weight slab (bf16 at rest, static lane slices) ----
    w_in = w_in_ref[...]                             # (D, 8D) bf16 = [Wqkv | Wo | W1]
    wqkv = w_in[:, 0:3 * emb_dim]                    # (D, 3D)
    wo = w_in[:, 3 * emb_dim:4 * emb_dim]            # (D, D)
    w1 = w_in[:, 4 * emb_dim:8 * emb_dim]            # (D, 4D)

    # ---- residual branch 1: LN1 + causal multi-head attention ----
    h = _layer_norm(x, n1s, n1b)                                           # (BT, D) f32
    qkv = jnp.dot(h.astype(bf16), wqkv, preferred_element_type=f32)        # (BT, 3D) f32

    # Pack heads into the sublane axis: (BT, D) per-head lane slices -> (H*BT, HD).
    def pack(base):
        return jnp.concatenate(
            [qkv[:, base + hh * head_dim: base + (hh + 1) * head_dim]
             for hh in range(num_heads)],
            axis=0)                                                        # (H*BT, HD)

    q_p = pack(0)
    k_p = pack(emb_dim)
    v_p = pack(2 * emb_dim)

    # One scores matmul for every head/batch at once ('rd,cd->rc').
    scores = lax.dot_general(q_p.astype(bf16), k_p.astype(bf16),
                             dimension_numbers=(((1,), (1,)), ((), ())),
                             preferred_element_type=f32)                   # (H*BT, H*BT)
    scores = scores * (1.0 / math.sqrt(head_dim)) + mask_ref[...]          # additive mask
    scores = scores - jnp.max(scores, axis=-1, keepdims=True)
    p = jnp.exp(scores)
    attn = p * pl.reciprocal(jnp.sum(p, axis=-1, keepdims=True), approx=True)

    ctx_p = jnp.dot(attn.astype(bf16), v_p.astype(bf16),
                    preferred_element_type=f32)                            # (H*BT, HD)

    # Unpack heads back to lanes: (H*BT, HD) -> (BT, D); then one out-projection.
    ctx = jnp.concatenate(
        [ctx_p[hh * bt:(hh + 1) * bt, :] for hh in range(num_heads)], axis=1)  # (BT, D)
    att_out = jnp.dot(ctx.astype(bf16), wo, preferred_element_type=f32) + bo
    x = x + att_out                                                        # dropout(p=0) == identity

    # ---- residual branch 2: LN2 + FeedForward ----
    h2 = _layer_norm(x, n2s, n2b)
    ff = jnp.dot(h2.astype(bf16), w1, preferred_element_type=f32) + b1     # (BT, 4D)
    ff = _gelu(ff)
    ff = jnp.dot(ff.astype(bf16), w2_ref[...], preferred_element_type=f32) + b2
    x = x + ff                                                             # dropout(p=0) == identity

    out_ref[...] = x.reshape(batch, seq_len, emb_dim)


# ------------------------------- wrapper -------------------------------------
def prepare_inputs(params):
    """One-time host-side restructuring (outside the per-call path)."""
    d, hd, hidden = D, HD, 4 * D

    # Fused weight slab [Wqkv | Wo | W1] stored bf16 (halves DMA bytes too).
    wqkv = jnp.concatenate([params["wq"], params["wk"], params["wv"]], axis=1)   # (D, 3D)
    w_in = jnp.concatenate([wqkv, params["wo"], params["w1"]], axis=1)           # (D, 8D)
    w_in = w_in.astype(jnp.bfloat16)
    w2 = params["w2"].astype(jnp.bfloat16)                                       # (4D, D)

    # One (8, 4D) f32 block with every small vector parameter.
    pvec = np.zeros((8, hidden), np.float32)
    pvec[0, :d] = np.asarray(params["n1s"]).reshape(-1)
    pvec[1, :d] = np.asarray(params["n1b"]).reshape(-1)
    pvec[2, :d] = np.asarray(params["n2s"]).reshape(-1)
    pvec[3, :d] = np.asarray(params["n2b"]).reshape(-1)
    pvec[4, :d] = np.asarray(params["bo"]).reshape(-1)
    pvec[5, :d] = np.asarray(params["b2"]).reshape(-1)
    pvec[6, :hidden] = np.asarray(params["b1"]).reshape(-1)

    # Additive mask over packed rows r = head*B*T + batch*T + token:
    # allow only same (head, batch) and non-future positions. Finite (-1e30),
    # and every row keeps its diagonal, so softmax never sees a fully-masked row.
    hbt = H * B * T
    r = np.arange(hbt)[:, None]
    c = np.arange(hbt)[None, :]
    allowed = ((r // T) == (c // T)) & ((r % T) >= (c % T))
    mask = np.where(allowed, 0.0, -1e30).astype(np.float32)

    return jnp.asarray(mask), w_in, w2, jnp.asarray(pvec)


@jax.jit
def transformer_block(x, mask, w_in, w2, pvec):
    b, t, d = x.shape
    kernel = partial(transformer_block_kernel, batch=b, seq_len=t,
                     num_heads=H, head_dim=d // H, emb_dim=d)
    # Single grid step: every input/output is a whole-array VMEM block;
    # no BlockSpec pipelining needed at this size.
    return pl.pallas_call(
        kernel,
        out_shape=jax.ShapeDtypeStruct((b, t, d), jnp.float32),
    )(x, mask, w_in, w2, pvec)


# --------------------------- pure-JAX reference -------------------------------
def reference(x, p):
    def ln(x, s, b):
        m = jnp.mean(x, -1, keepdims=True)
        v = jnp.mean((x - m) ** 2, -1, keepdims=True)
        return s * (x - m) / jnp.sqrt(v + EPS) + b

    def gelu(x):
        return 0.5 * x * (1 + jnp.tanh(jnp.sqrt(2.0 / jnp.pi) * (x + 0.044715 * x ** 3)))

    h = ln(x, p["n1s"][0], p["n1b"][0])
    q = h @ p["wq"]; k = h @ p["wk"]; v = h @ p["wv"]
    q = q.reshape(B, T, H, HD).transpose(0, 2, 1, 3)
    k = k.reshape(B, T, H, HD).transpose(0, 2, 1, 3)
    v = v.reshape(B, T, H, HD).transpose(0, 2, 1, 3)
    s = jnp.einsum("bhqd,bhkd->bhqk", q, k) / jnp.sqrt(HD)
    mask = jnp.triu(jnp.ones((T, T), bool), 1)
    s = jnp.where(mask, -jnp.inf, s)
    a = jax.nn.softmax(s, axis=-1)
    ctx = jnp.einsum("bhqk,bhkd->bhqd", a, v).transpose(0, 2, 1, 3).reshape(B, T, D)
    x = x + (ctx @ p["wo"] + p["bo"][0])
    h2 = ln(x, p["n2s"][0], p["n2b"][0])
    ff = gelu(h2 @ p["w1"] + p["b1"][0]) @ p["w2"] + p["b2"][0]
    return x + ff


# --------------------------------- main ---------------------------------------
if __name__ == "__main__":
    key = jax.random.PRNGKey(0)
    keys = jax.random.split(key, 8)
    init = lambda k, shape: (0.02 * jax.random.normal(k, shape)).astype(jnp.float32)

    params = {
        "wq": init(keys[0], (D, D)),
        "wk": init(keys[1], (D, D)),
        "wv": init(keys[2], (D, D)),
        "wo": init(keys[3], (D, D)),
        "bo": jnp.zeros((1, D), jnp.float32),
        "n1s": jnp.ones((1, D), jnp.float32),
        "n1b": jnp.zeros((1, D), jnp.float32),
        "n2s": jnp.ones((1, D), jnp.float32),
        "n2b": jnp.zeros((1, D), jnp.float32),
        "w1": init(keys[4], (D, 4 * D)),
        "b1": jnp.zeros((1, 4 * D), jnp.float32),
        "w2": init(keys[5], (4 * D, D)),
        "b2": jnp.zeros((1, D), jnp.float32),
    }

    x = jax.random.normal(keys[6], (B, T, D), jnp.float32)

    mask, w_in, w2, pvec = prepare_inputs(params)     # one-time host restructuring
    out = transformer_block(x, mask, w_in, w2, pvec)
    out = jax.block_until_ready(out)

    ref = reference(x, params)
    assert out.shape == (B, T, D)
    # bf16 MXU operands -> loosened tolerance (per review).
    assert jnp.allclose(out, ref, atol=1e-2, rtol=1e-2), "mismatch vs pure-JAX reference"
    print("KERNEL_OK")
</pallas_src>

<mosaic_0001>
module attributes {stable_mosaic.version = 11 : i64} {
  func.func @transformer_block_kernel(%arg0: memref<2x8x32xf32, #tpu.memory_space<vmem>>, %arg1: memref<64x64xf32, #tpu.memory_space<vmem>>, %arg2: memref<32x256xbf16, #tpu.memory_space<vmem>>, %arg3: memref<128x32xbf16, #tpu.memory_space<vmem>>, %arg4: memref<8x128xf32, #tpu.memory_space<vmem>>, %arg5: memref<2x8x32xf32, #tpu.memory_space<vmem>>) attributes {dimension_semantics = [], scalar_prefetch = 0 : i64, scratch_operands = 0 : i64, tpu.core_type = #tpu.core_type<tc>} {
    %c0 = arith.constant 0 : index
    %c0_0 = arith.constant 0 : index
    %c0_1 = arith.constant 0 : index
    %0 = vector.load %arg0[%c0, %c0_0, %c0_1] : memref<2x8x32xf32, #tpu.memory_space<vmem>>, vector<2x8x32xf32>
    %1 = vector.shape_cast %0 : vector<2x8x32xf32> to vector<16x32xf32>
    %c0_2 = arith.constant 0 : index
    %c0_3 = arith.constant 0 : index
    %2 = vector.load %arg4[%c0_2, %c0_3] : memref<8x128xf32, #tpu.memory_space<vmem>>, vector<8x128xf32>
    %3 = vector.extract_strided_slice %2 {offsets = [0, 0], sizes = [1, 32], strides = [1, 1]} : vector<8x128xf32> to vector<1x32xf32>
    %4 = vector.extract_strided_slice %2 {offsets = [1, 0], sizes = [1, 32], strides = [1, 1]} : vector<8x128xf32> to vector<1x32xf32>
    %5 = vector.extract_strided_slice %2 {offsets = [2, 0], sizes = [1, 32], strides = [1, 1]} : vector<8x128xf32> to vector<1x32xf32>
    %6 = vector.extract_strided_slice %2 {offsets = [3, 0], sizes = [1, 32], strides = [1, 1]} : vector<8x128xf32> to vector<1x32xf32>
    %7 = vector.extract_strided_slice %2 {offsets = [4, 0], sizes = [1, 32], strides = [1, 1]} : vector<8x128xf32> to vector<1x32xf32>
    %8 = vector.extract_strided_slice %2 {offsets = [5, 0], sizes = [1, 32], strides = [1, 1]} : vector<8x128xf32> to vector<1x32xf32>
    %9 = vector.extract_strided_slice %2 {offsets = [6, 0], sizes = [1, 128], strides = [1, 1]} : vector<8x128xf32> to vector<1x128xf32>
    %c0_4 = arith.constant 0 : index
    %c0_5 = arith.constant 0 : index
    %10 = vector.load %arg2[%c0_4, %c0_5] : memref<32x256xbf16, #tpu.memory_space<vmem>>, vector<32x256xbf16>
    %11 = vector.extract_strided_slice %10 {offsets = [0, 0], sizes = [32, 96], strides = [1, 1]} : vector<32x256xbf16> to vector<32x96xbf16>
    %12 = vector.extract_strided_slice %10 {offsets = [0, 96], sizes = [32, 32], strides = [1, 1]} : vector<32x256xbf16> to vector<32x32xbf16>
    %13 = vector.extract_strided_slice %10 {offsets = [0, 128], sizes = [32, 128], strides = [1, 1]} : vector<32x256xbf16> to vector<32x128xbf16>
    %cst = arith.constant dense<0.000000e+00> : vector<16xf32>
    %14 = vector.multi_reduction <add>, %1, %cst [1] : vector<16x32xf32> to vector<16xf32>
    %15 = vector.shape_cast %14 : vector<16xf32> to vector<16x1xf32>
    %cst_6 = arith.constant 3.200000e+01 : f32
    %16 = vector.broadcast %cst_6 : f32 to vector<16x1xf32>
    %17 = arith.divf %15, %16 : vector<16x1xf32>
    %18 = vector.broadcast %17 : vector<16x1xf32> to vector<16x32xf32>
    %19 = arith.subf %1, %18 : vector<16x32xf32>
    %20 = arith.mulf %19, %19 : vector<16x32xf32>
    %cst_7 = arith.constant dense<0.000000e+00> : vector<16xf32>
    %21 = vector.multi_reduction <add>, %20, %cst_7 [1] : vector<16x32xf32> to vector<16xf32>
    %22 = vector.shape_cast %21 : vector<16xf32> to vector<16x1xf32>
    %cst_8 = arith.constant 3.200000e+01 : f32
    %23 = vector.broadcast %cst_8 : f32 to vector<16x1xf32>
    %24 = arith.divf %22, %23 : vector<16x1xf32>
    %25 = vector.broadcast %17 : vector<16x1xf32> to vector<16x32xf32>
    %26 = arith.subf %1, %25 : vector<16x32xf32>
    %cst_9 = arith.constant 9.99999974E-6 : f32
    %27 = vector.broadcast %cst_9 : f32 to vector<16x1xf32>
    %28 = arith.addf %24, %27 : vector<16x1xf32>
    %29 = math.rsqrt %28 : vector<16x1xf32>
    %30 = vector.broadcast %29 : vector<16x1xf32> to vector<16x32xf32>
    %31 = arith.mulf %26, %30 : vector<16x32xf32>
    %32 = vector.broadcast %3 : vector<1x32xf32> to vector<16x32xf32>
    %33 = arith.mulf %32, %31 : vector<16x32xf32>
    %34 = vector.broadcast %4 : vector<1x32xf32> to vector<16x32xf32>
    %35 = arith.addf %33, %34 : vector<16x32xf32>
    %36 = arith.truncf %35 : vector<16x32xf32> to vector<16x32xbf16>
    %cst_10 = arith.constant dense<0.000000e+00> : vector<16x96xf32>
    %37 = tpu.matmul %36, %11, %cst_10 {dimension_numbers = #tpu.dot_dimension_numbers<[1], [0], [0], [1], [0, 0, 1, 1], [], []>} : vector<16x32xbf16>, vector<32x96xbf16>, vector<16x96xf32> -> vector<16x96xf32>
    %38 = vector.extract_strided_slice %37 {offsets = [0, 0], sizes = [16, 8], strides = [1, 1]} : vector<16x96xf32> to vector<16x8xf32>
    %39 = vector.extract_strided_slice %37 {offsets = [0, 8], sizes = [16, 8], strides = [1, 1]} : vector<16x96xf32> to vector<16x8xf32>
    %40 = vector.extract_strided_slice %37 {offsets = [0, 16], sizes = [16, 8], strides = [1, 1]} : vector<16x96xf32> to vector<16x8xf32>
    %41 = vector.extract_strided_slice %37 {offsets = [0, 24], sizes = [16, 8], strides = [1, 1]} : vector<16x96xf32> to vector<16x8xf32>
    %42 = tpu.concatenate %38, %39, %40, %41 in 0 : vector<16x8xf32>, vector<16x8xf32>, vector<16x8xf32>, vector<16x8xf32> -> vector<64x8xf32>
    %43 = vector.extract_strided_slice %37 {offsets = [0, 32], sizes = [16, 8], strides = [1, 1]} : vector<16x96xf32> to vector<16x8xf32>
    %44 = vector.extract_strided_slice %37 {offsets = [0, 40], sizes = [16, 8], strides = [1, 1]} : vector<16x96xf32> to vector<16x8xf32>
    %45 = vector.extract_strided_slice %37 {offsets = [0, 48], sizes = [16, 8], strides = [1, 1]} : vector<16x96xf32> to vector<16x8xf32>
    %46 = vector.extract_strided_slice %37 {offsets = [0, 56], sizes = [16, 8], strides = [1, 1]} : vector<16x96xf32> to vector<16x8xf32>
    %47 = tpu.concatenate %43, %44, %45, %46 in 0 : vector<16x8xf32>, vector<16x8xf32>, vector<16x8xf32>, vector<16x8xf32> -> vector<64x8xf32>
    %48 = vector.extract_strided_slice %37 {offsets = [0, 64], sizes = [16, 8], strides = [1, 1]} : vector<16x96xf32> to vector<16x8xf32>
    %49 = vector.extract_strided_slice %37 {offsets = [0, 72], sizes = [16, 8], strides = [1, 1]} : vector<16x96xf32> to vector<16x8xf32>
    %50 = vector.extract_strided_slice %37 {offsets = [0, 80], sizes = [16, 8], strides = [1, 1]} : vector<16x96xf32> to vector<16x8xf32>
    %51 = vector.extract_strided_slice %37 {offsets = [0, 88], sizes = [16, 8], strides = [1, 1]} : vector<16x96xf32> to vector<16x8xf32>
    %52 = tpu.concatenate %48, %49, %50, %51 in 0 : vector<16x8xf32>, vector<16x8xf32>, vector<16x8xf32>, vector<16x8xf32> -> vector<64x8xf32>
    %53 = arith.truncf %42 : vector<64x8xf32> to vector<64x8xbf16>
    %54 = arith.truncf %47 : vector<64x8xf32> to vector<64x8xbf16>
    %cst_11 = arith.constant dense<0.000000e+00> : vector<64x64xf32>
    %55 = tpu.matmul %53, %54, %cst_11 {dimension_numbers = #tpu.dot_dimension_numbers<[1], [1], [0], [0], [0, 0, 1, 0], [], []>} : vector<64x8xbf16>, vector<64x8xbf16>, vector<64x64xf32> -> vector<64x64xf32>
    %cst_12 = arith.constant 0.353553385 : f32
    %56 = vector.broadcast %cst_12 : f32 to vector<64x64xf32>
    %57 = arith.mulf %55, %56 : vector<64x64xf32>
    %c0_13 = arith.constant 0 : index
    %c0_14 = arith.constant 0 : index
    %58 = vector.load %arg1[%c0_13, %c0_14] : memref<64x64xf32, #tpu.memory_space<vmem>>, vector<64x64xf32>
    %59 = arith.addf %57, %58 : vector<64x64xf32>
    %cst_15 = arith.constant dense<0xFF800000> : vector<64xf32>
    %60 = vector.multi_reduction <maximumf>, %59, %cst_15 [1] : vector<64x64xf32> to vector<64xf32>
    %61 = vector.shape_cast %60 : vector<64xf32> to vector<64x1xf32>
    %62 = vector.broadcast %61 : vector<64x1xf32> to vector<64x64xf32>
    %63 = arith.subf %59, %62 : vector<64x64xf32>
    %64 = math.exp %63 : vector<64x64xf32>
    %cst_16 = arith.constant dense<0.000000e+00> : vector<64xf32>
    %65 = vector.multi_reduction <add>, %64, %cst_16 [1] : vector<64x64xf32> to vector<64xf32>
    %66 = vector.shape_cast %65 : vector<64xf32> to vector<64x1xf32>
    %67 = tpu.reciprocal %66 {approx = true} : vector<64x1xf32> -> vector<64x1xf32>
    %68 = vector.broadcast %67 : vector<64x1xf32> to vector<64x64xf32>
    %69 = arith.mulf %64, %68 : vector<64x64xf32>
    %70 = arith.truncf %69 : vector<64x64xf32> to vector<64x64xbf16>
    %71 = arith.truncf %52 : vector<64x8xf32> to vector<64x8xbf16>
    %cst_17 = arith.constant dense<0.000000e+00> : vector<64x8xf32>
    %72 = tpu.matmul %70, %71, %cst_17 {dimension_numbers = #tpu.dot_dimension_numbers<[1], [0], [0], [1], [0, 0, 1, 1], [], []>} : vector<64x64xbf16>, vector<64x8xbf16>, vector<64x8xf32> -> vector<64x8xf32>
    %73 = vector.extract_strided_slice %72 {offsets = [0, 0], sizes = [16, 8], strides = [1, 1]} : vector<64x8xf32> to vector<16x8xf32>
    %74 = vector.extract_strided_slice %72 {offsets = [16, 0], sizes = [16, 8], strides = [1, 1]} : vector<64x8xf32> to vector<16x8xf32>
    %75 = vector.extract_strided_slice %72 {offsets = [32, 0], sizes = [16, 8], strides = [1, 1]} : vector<64x8xf32> to vector<16x8xf32>
    %76 = vector.extract_strided_slice %72 {offsets = [48, 0], sizes = [16, 8], strides = [1, 1]} : vector<64x8xf32> to vector<16x8xf32>
    %77 = tpu.concatenate %73, %74, %75, %76 in 1 : vector<16x8xf32>, vector<16x8xf32>, vector<16x8xf32>, vector<16x8xf32> -> vector<16x32xf32>
    %78 = arith.truncf %77 : vector<16x32xf32> to vector<16x32xbf16>
    %cst_18 = arith.constant dense<0.000000e+00> : vector<16x32xf32>
    %79 = tpu.matmul %78, %12, %cst_18 {dimension_numbers = #tpu.dot_dimension_numbers<[1], [0], [0], [1], [0, 0, 1, 1], [], []>} : vector<16x32xbf16>, vector<32x32xbf16>, vector<16x32xf32> -> vector<16x32xf32>
    %80 = vector.broadcast %7 : vector<1x32xf32> to vector<16x32xf32>
    %81 = arith.addf %79, %80 : vector<16x32xf32>
    %82 = arith.addf %1, %81 : vector<16x32xf32>
    %cst_19 = arith.constant dense<0.000000e+00> : vector<16xf32>
    %83 = vector.multi_reduction <add>, %82, %cst_19 [1] : vector<16x32xf32> to vector<16xf32>
    %84 = vector.shape_cast %83 : vector<16xf32> to vector<16x1xf32>
    %cst_20 = arith.constant 3.200000e+01 : f32
    %85 = vector.broadcast %cst_20 : f32 to vector<16x1xf32>
    %86 = arith.divf %84, %85 : vector<16x1xf32>
    %87 = vector.broadcast %86 : vector<16x1xf32> to vector<16x32xf32>
    %88 = arith.subf %82, %87 : vector<16x32xf32>
    %89 = arith.mulf %88, %88 : vector<16x32xf32>
    %cst_21 = arith.constant dense<0.000000e+00> : vector<16xf32>
    %90 = vector.multi_reduction <add>, %89, %cst_21 [1] : vector<16x32xf32> to vector<16xf32>
    %91 = vector.shape_cast %90 : vector<16xf32> to vector<16x1xf32>
    %cst_22 = arith.constant 3.200000e+01 : f32
    %92 = vector.broadcast %cst_22 : f32 to vector<16x1xf32>
    %93 = arith.divf %91, %92 : vector<16x1xf32>
    %94 = vector.broadcast %86 : vector<16x1xf32> to vector<16x32xf32>
    %95 = arith.subf %82, %94 : vector<16x32xf32>
    %cst_23 = arith.constant 9.99999974E-6 : f32
    %96 = vector.broadcast %cst_23 : f32 to vector<16x1xf32>
    %97 = arith.addf %93, %96 : vector<16x1xf32>
    %98 = math.rsqrt %97 : vector<16x1xf32>
    %99 = vector.broadcast %98 : vector<16x1xf32> to vector<16x32xf32>
    %100 = arith.mulf %95, %99 : vector<16x32xf32>
    %101 = vector.broadcast %5 : vector<1x32xf32> to vector<16x32xf32>
    %102 = arith.mulf %101, %100 : vector<16x32xf32>
    %103 = vector.broadcast %6 : vector<1x32xf32> to vector<16x32xf32>
    %104 = arith.addf %102, %103 : vector<16x32xf32>
    %105 = arith.truncf %104 : vector<16x32xf32> to vector<16x32xbf16>
    %cst_24 = arith.constant dense<0.000000e+00> : vector<16x128xf32>
    %106 = tpu.matmul %105, %13, %cst_24 {dimension_numbers = #tpu.dot_dimension_numbers<[1], [0], [0], [1], [0, 0, 1, 1], [], []>} : vector<16x32xbf16>, vector<32x128xbf16>, vector<16x128xf32> -> vector<16x128xf32>
    %107 = vector.broadcast %9 : vector<1x128xf32> to vector<16x128xf32>
    %108 = arith.addf %106, %107 : vector<16x128xf32>
    %cst_25 = arith.constant 5.000000e-01 : f32
    %109 = vector.broadcast %cst_25 : f32 to vector<16x128xf32>
    %110 = arith.mulf %109, %108 : vector<16x128xf32>
    %cst_26 = arith.constant 4.471500e-02 : f32
    %111 = vector.broadcast %cst_26 : f32 to vector<16x128xf32>
    %112 = arith.mulf %111, %108 : vector<16x128xf32>
    %113 = arith.mulf %112, %108 : vector<16x128xf32>
    %114 = arith.mulf %113, %108 : vector<16x128xf32>
    %115 = arith.addf %108, %114 : vector<16x128xf32>
    %cst_27 = arith.constant 0.797884583 : f32
    %116 = vector.broadcast %cst_27 : f32 to vector<16x128xf32>
    %117 = arith.mulf %116, %115 : vector<16x128xf32>
    %118 = math.tanh %117 : vector<16x128xf32>
    %cst_28 = arith.constant 1.000000e+00 : f32
    %119 = vector.broadcast %cst_28 : f32 to vector<16x128xf32>
    %120 = arith.addf %119, %118 : vector<16x128xf32>
    %121 = arith.mulf %110, %120 : vector<16x128xf32>
    %122 = arith.truncf %121 : vector<16x128xf32> to vector<16x128xbf16>
    %c0_29 = arith.constant 0 : index
    %c0_30 = arith.constant 0 : index
    %123 = vector.load %arg3[%c0_29, %c0_30] : memref<128x32xbf16, #tpu.memory_space<vmem>>, vector<128x32xbf16>
    %cst_31 = arith.constant dense<0.000000e+00> : vector<16x32xf32>
    %124 = tpu.matmul %122, %123, %cst_31 {dimension_numbers = #tpu.dot_dimension_numbers<[1], [0], [0], [1], [0, 0, 1, 1], [], []>} : vector<16x128xbf16>, vector<128x32xbf16>, vector<16x32xf32> -> vector<16x32xf32>
    %125 = vector.broadcast %8 : vector<1x32xf32> to vector<16x32xf32>
    %126 = arith.addf %124, %125 : vector<16x32xf32>
    %127 = arith.addf %82, %126 : vector<16x32xf32>
    %128 = vector.shape_cast %127 : vector<16x32xf32> to vector<2x8x32xf32>
    %c0_32 = arith.constant 0 : index
    %c0_33 = arith.constant 0 : index
    %c0_34 = arith.constant 0 : index
    %129 = vector.load %arg5[%c0_32, %c0_33, %c0_34] : memref<2x8x32xf32, #tpu.memory_space<vmem>>, vector<2x8x32xf32>
    tpu.vector_store %arg5[%c0_32, %c0_33, %c0_34], %128 {strides = array<i32>} : memref<2x8x32xf32, #tpu.memory_space<vmem>>, vector<2x8x32xf32>,
    return
  }
}

</mosaic_0001>

<bundles_post_ra>
// kernel: transformer_block.1
= control target key start
LH: loop header
LB: loop body
LE: loop exit
PB: predicated region body
PF: predicated region fallthrough
CT: control target
= control target key end

     0   :  { %10 = vsyncpa [#allocation3], 0  ;;  %s1386_s0 = inlined_call_operand.vmem [shape: f32[2,8,32], index: 0, kind: input, shape index: {}]   ;;  %s1387_s1 = inlined_call_operand.vmem [shape: f32[64,64], index: 1, kind: input, shape index: {}]   ;;  %s1388_s2 = inlined_call_operand.hbm [shape: bf16[32,256], index: 2, kind: input, shape index: {}]   ;;  %s1389_s3 = inlined_call_operand.vmem [shape: bf16[128,32], index: 3, kind: input, shape index: {}]   ;;  %s1390_s4 = inlined_call_operand.hbm [shape: f32[8,128], index: 4, kind: input, shape index: {}]   ;;  %s1391_s5 = inlined_call_operand.hbm [shape: f32[2,8,32], index: 5, kind: output, shape index: {}]  }
   0x1   :  { %11 = vsyncpa [#allocation6], 0 }
   0x2   :  { %12 = vsyncpa [#allocation4], 0  ;;  %s1124_s18 = smov [#allocation2]  }
   0x3   :  { %s22_s19 = sshll.u32 %s1124_s18, 4  ;;  %s23_s19 = int_to_ptr.vmem [resolvable:$true] %s22_s19 }
   0x4   :  { %s1066_s20 = scalar_lea.vmem %s23_s19, 512  ;;  %p1071_p1 = scmp.lt.s32.totalorder %s23_s19, %s23_s19 }
   0x5   :  { %p1067_p0 = scmp.ne.s32.totalorder %s23_s19, %s1066_s20  ;;  %p1072_p2 = scmp.lt.s32.totalorder %s1066_s20, %s1066_s20 }
   0x7   :  { %p1073_p3 = por %p1072_p2, %p1071_p1 }
   0x9   :  { %p1074_p4 = pnand %p1073_p3, %p1067_p0 }
   0xb   :  { %1077 = shalt.err (!%p1074_p4)
}
   0xc   :  { %s1125_s21 = smov 128   ;;  %s1126_s22 = smov 8  }
   0xd   :  { %28 = dma.hbm_to_vmem [thread:$0]  %s1388_s2, 512, %s23_s19, [#allocation3], %s1125_s21, %s1125_s21, %s1126_s22  }
   0xe   :  { %s1127_s25 = smov [#allocation5]  }
   0xf   :  { %s37_s26 = sshll.u32 %s1127_s25, 4  ;;  %s38_s26 = int_to_ptr.vmem [resolvable:$true] %s37_s26 }
  0x10   :  { %s1086_s27 = scalar_lea.vmem %s38_s26, 128  ;;  %p1091_p6 = scmp.lt.s32.totalorder %s38_s26, %s38_s26 }
  0x11   :  { %p1087_p5 = scmp.ne.s32.totalorder %s38_s26, %s1086_s27  ;;  %p1092_p7 = scmp.lt.s32.totalorder %s1086_s27, %s1086_s27 }
  0x13   :  { %p1093_p8 = por %p1092_p7, %p1091_p6 }
  0x15   :  { %p1094_p9 = pnand %p1093_p8, %p1087_p5 }
  0x17   :  { %1097 = shalt.err (!%p1094_p9)
}
  0x18   :  { %40 = dma.hbm_to_vmem [thread:$0]  %s1390_s4, 128, %s38_s26, [#allocation6]  }
  0x19   :  { %1118 = dma.done.wait [#allocation3], 512  }
  0x1a   :  { %1119 = vsyncadd [#allocation3], 4294966784 }
  0x1b   :  { %1120 = dma.done.wait [#allocation6], 128  }
  0x1c   :  { %1121 = vsyncadd [#allocation6], 4294967168  ;;  %vm55_vm0 = vcmask 261120   ;;  %v1181_v0 = vld [vmem:[%s1386_s0] sm:$0xff]  ;;  %v1186_v1 = vld [vmem:[%s1386_s0 + $0x8] sm:$0xff]  ;;  %v1128_v15 = vmov 0.0   ;;  %v83_v23 = vlaneseq }
  0x1d   :  { %v56_v2 = vsel %vm55_vm0, %v1181_v0, 0.0  ;;  %v59_v3 = vsel %vm55_vm0, %v1186_v1, 0.0  ;;  %v1196_v14 = vld [vmem:[#allocation2 + $0x10] ss:$8 sps:$4 sm:$0xff]   ;;  %875 = vmatprep.subr.bf16.mxu0 %v1128_v15  ;;  %vm1129_vm1 = vmmov 0   ;;  %v1209_v26 = vld [vmem:[#allocation5] sm:$0xff] }
  0x1e   :  { %57 = vadd.xlane.f32.xlu0 %v56_v2  ;;  %879 = vmatprep.mubr.msk.bf16.mxu0 %vm1129_vm1, %v1128_v15  ;;  %v1202_v16 = vld [vmem:[#allocation2] ss:$8 sps:$4 sm:$0xff]   ;;  %v1206_v24 = vshrl.u32 %v83_v23, 7  ;;  %vm188_vm2 = vcmask 64512   ;;  %s1130_s0 = smov 112   ;;  %s1131_s4 = smov 104  }
  0x1f   :  { %876 = vmatpush3.bf16.msra.mxu0 %v1196_v14  ;;  %s1132_s8 = smov 120   ;;  %s1133_s9 = smov 96   ;;  %vm302_vm3 = vcmask 523264   ;;  %vm510_vm4 = vcmask 130048   ;;  %vm513_vm5 = vcmask 195584  }
  0x20   :  { %877 = vmatprep.subr.bf16.mxu0 %v1128_v15  ;;  %v85_v25 = vsub.s32 0, %v1206_v24  ;;  %v91_v30 = vsub.s32 1, %v1206_v24  ;;  %s1134_s28 = smov 64   ;;  %s1136_s29 = smov 24  }
  0x21   :  { %s1137_s2 = smov 16  }
  0x22   :  { %60 = vadd.xlane.f32.xlu0 %v59_v3  ;;  %v86_v29 = vrot.slane %v1209_v26, %v85_v25  ;;  %v92_v34 = vrot.slane %v1209_v26, %v91_v30 }
  0x23   :  { %878 = vmatpush3.bf16.msra.mxu0 %v1202_v16 }
  0xa7   :  { %v58_v4 = vpop.xlane.xlu0 %57 }
  0xa8   :  { %v63_v5 = vmul.f32 0.03125, %v58_v4  ;;  %v288_v4 = vld [vmem:[%s1387_s1 + $0x10] sm:$0xff] }
  0xaa   :  { %v65_v6 = vsub.f32 %v1181_v0, %v63_v5 }
  0xab   :  { %v61_v7 = vpop.xlane.xlu0 %60 }
  0xac   :  { %v64_v8 = vmul.f32 0.03125, %v61_v7  ;;  %v67_v9 = vmul.f32 %v65_v6, %v65_v6  ;;  %v286_v7 = vld [vmem:[%s1387_s1] sm:$0xff] }
  0xae   :  { %v66_v10 = vsub.f32 %v1186_v1, %v64_v8  ;;  %v69_v11 = vsel %vm55_vm0, %v67_v9, 0.0 }
  0xaf   :  { %70 = vadd.xlane.f32.xlu1 %v69_v11 }
  0xb0   :  { %v68_v12 = vmul.f32 %v66_v10, %v66_v10 }
  0xb2   :  { %v72_v13 = vsel %vm55_vm0, %v68_v12, 0.0 }
  0xb3   :  { %73 = vadd.xlane.f32.xlu1 %v72_v13 }
 0x138   :  { %v71_v17 = vpop.xlane.xlu1 %70 }
 0x139   :  { %v75_v18 = vmul.f32 0.03125, %v71_v17 }
 0x13b   :  { %v77_v19 = vadd.f32 1e-05, %v75_v18  ;;  %v287_v18 = vld [vmem:[%s1387_s1 + $0x8] sm:$0xff] }
 0x13c   :  { %v74_v20 = vpop.xlane.xlu1 %73 }
 0x13d   :  { %1014 = vrsqrt.f32 %v77_v19  ;;  %v76_v21 = vmul.f32 0.03125, %v74_v20 }
 0x13f   :  { %v78_v22 = vadd.f32 1e-05, %v76_v21  ;;  %v289_v21 = vld [vmem:[%s1387_s1 + $0x18] sm:$0xff] }
 0x141   :  { %1016 = vrsqrt.f32 %v78_v22 }
 0x14a   :  { %v1015_v27 = vpop.eup %1014 }
 0x14b   :  { %v81_v28 = vmul.f32 %v1015_v27, %v65_v6 }
 0x14d   :  { %v87_v33 = vmul.f32 %v86_v29, %v81_v28  ;;  %v290_v28 = vld [vmem:[%s1387_s1 + $0x20] sm:$0xff] }
 0x14e   :  { %v1017_v31 = vpop.eup %1016 }
 0x14f   :  { %v82_v32 = vmul.f32 %v1017_v31, %v66_v10  ;;  %v93_v36 = vadd.f32 %v92_v34, %v87_v33  ;;  %v292_v33 = vld [vmem:[%s1387_s1 + $0x30] sm:$0xff] }
 0x151   :  { %v88_v35 = vmul.f32 %v86_v29, %v82_v32 }
 0x153   :  { %v94_v37 = vadd.f32 %v92_v34, %v88_v35 }
 0x155   :  { %v95_v38 = vpack.c.bf16 %v94_v37, %v93_v36  ;;  %v291_v37 = vld [vmem:[%s1387_s1 + $0x28] sm:$0xff] }
 0x157   :  { %880 = vmatmul.mubr.msk.bf16.vlgmr.msra.gmra.mxu0 %vm55_vm0, %v95_v38 }
 0x217   :  { %v145_v39 = vpop.f32.mrf.mxu0 }
 0x219   :  { %v881_v40 = vpop.f32.mrf.mxu0 }
 0x21b   :  { %v148_v41 = vpop.f32.mrf.mxu0 }
 0x21c   :  { %v975_v42 = vpack.i.bf16 %v148_v41, %v145_v39  ;;  %v1215_v43 = vpack.c.bf16 %v148_v41, %v145_v39 }
 0x21d   :  { %v882_v44 = vpop.f32.mrf.mxu0 }
 0x21e   :  { %976 = vrot.lane.b32.xlu1 %v975_v42, %s1130_s0  ;;  %971 = vrot.lane.b32.xlu0 %v975_v42, %s1131_s4 }
 0x21f   :  { %891 = vmatprep.mubr.msk.bf16.mxu1 %vm188_vm2, %v1215_v43 }
 0x222   :  { %981 = vrot.lane.b32.xlu1 %v975_v42, %s1132_s8  ;;  %v293_v42 = vld [vmem:[%s1387_s1 + $0x38] sm:$0xff]  ;;  %s1135_s1 = smov 32  }
 0x290   :  { %v977_v45 = vpop.permute.xlu1 %976  ;;  %v972_v46 = vpop.permute.xlu0 %971 }
 0x291   :  { %v979_v47 = vunpack.i.h.bf16 %v977_v45  ;;  %v978_v48 = vunpack.i.l.bf16 %v977_v45  ;;  %v974_v49 = vunpack.i.h.bf16 %v972_v46  ;;  %v973_v50 = vunpack.i.l.bf16 %v972_v46 }
 0x293   :  { %v1219_v51 = vpack.c.bf16 %v979_v47, %v978_v48  ;;  %v1221_v52 = vpack.c.bf16 %v974_v49, %v973_v50 }
 0x294   :  { %v982_v53 = vpop.permute.xlu1 %981 }
 0x295   :  { %v984_v54 = vunpack.i.h.bf16 %v982_v53  ;;  %v983_v55 = vunpack.i.l.bf16 %v982_v53  ;;  %184 = vrot.lane.b32.xlu0 %v1219_v51, %s1133_s9  ;;  %186 = vrot.lane.b32.xlu1 %v1221_v52, %s1133_s9 }
 0x297   :  { %v1225_v56 = vpack.c.bf16 %v984_v54, %v983_v55 }
 0x299   :  { %182 = vrot.lane.b32.xlu1 %v1225_v56, %s1133_s9  ;;  %180 = vrot.lane.b32.xlu0 %v1215_v43, %s1133_s9 }
 0x307   :  { %v187_v57 = vpop.permute.xlu1 %186  ;;  %v185_v59 = vpop.permute.xlu0 %184 }
 0x308   :  { %951 = vmatprep.subr.msk.bf16.mxu1 %vm188_vm2, %v187_v57  ;;  %v211_v58 = vsel %vm188_vm2, %v187_v57, 0  ;;  %v208_v60 = vsel %vm188_vm2, %v185_v59, 0 }
 0x309   :  { %884 = vmatpush3.bf16.xpose.msra.mxu1 %v211_v58 }
 0x30a   :  { %952 = vmatprep.subr.msk.bf16.mxu1 %vm188_vm2, %v185_v59 }
 0x30b   :  { %v183_v61 = vpop.permute.xlu1 %182  ;;  %v181_v63 = vpop.permute.xlu0 %180 }
 0x30c   :  { %v205_v62 = vsel %vm188_vm2, %v183_v61, 0  ;;  %v202_v2 = vsel %vm188_vm2, %v181_v63, 0 }
 0x311   :  { %886 = vmatpush3.bf16.xpose.msra.mxu1 %v208_v60 }
 0x312   :  { %953 = vmatprep.subr.msk.bf16.mxu1 %vm188_vm2, %v183_v61 }
 0x319   :  { %888 = vmatpush3.bf16.xpose.msra.mxu1 %v205_v62 }
 0x31a   :  { %954 = vmatprep.subr.msk.bf16.mxu1 %vm188_vm2, %v181_v63 }
 0x321   :  { %890 = vmatpush3.bf16.xpose.msra.mxu1 %v202_v2 }
 0x322   :  { %931 = vmatprep.subr.bf16.mxu1 %v1128_v15 }
 0x328   :  { %892 = vmatmul.mubr.msk.bf16.vlgmr.msra.gmra.mxu1 %vm188_vm2, %v1225_v56 }
 0x329   :  { %895 = vmatprep.mubr.msk.bf16.mxu1 %vm188_vm2, %v1219_v51 }
 0x330   :  { %896 = vmatmul.mubr.msk.bf16.gmra.mxu1 %vm188_vm2, %v1221_v52 }
 0x331   :  { %947 = vmatprep.mubr.msk.bf16.mxu1 %vm1129_vm1, %v1128_v15 }
 0x3e8   :  { %v893_v3 = vpop.f32.mrf.mxu1 }
 0x3e9   :  { %v280_v5 = vmul.f32 0.35355338, %v893_v3 }
 0x3ea   :  { %v247_v6 = vpop.f32.mrf.mxu1 }
 0x3eb   :  { %v278_v8 = vmul.f32 0.35355338, %v247_v6  ;;  %v296_v9 = vadd.f32 %v288_v4, %v280_v5 }
 0x3ec   :  { %v894_v10 = vpop.f32.mrf.mxu1 }
 0x3ed   :  { %v309_v11 = vsel %vm302_vm3, %v296_v9, -inf  ;;  %v294_v12 = vadd.f32 %v286_v7, %v278_v8  ;;  %v281_v13 = vmul.f32 0.35355338, %v894_v10 }
 0x3ee   :  { %310 = vmax.xlane.f32.xlu0 %v309_v11  ;;  %v250_v17 = vpop.f32.mrf.mxu1 }
 0x3ef   :  { %v279_v19 = vmul.f32 0.35355338, %v250_v17  ;;  %v303_v20 = vsel %vm302_vm3, %v294_v12, -inf  ;;  %v297_v27 = vadd.f32 %v289_v21, %v281_v13 }
 0x3f0   :  { %304 = vmax.xlane.f32.xlu1 %v303_v20  ;;  %v897_v22 = vpop.f32.mrf.mxu1 }
 0x3f1   :  { %v295_v23 = vadd.f32 %v287_v18, %v279_v19  ;;  %v284_v29 = vmul.f32 0.35355338, %v897_v22  ;;  %v312_v36 = vsel %vm302_vm3, %v297_v27, -inf }
 0x3f2   :  { %v263_v25 = vpop.f32.mrf.mxu1 }
 0x3f3   :  { %v282_v30 = vmul.f32 0.35355338, %v263_v25  ;;  %v306_v31 = vsel %vm302_vm3, %v295_v23, -inf  ;;  %v300_v41 = vadd.f32 %v292_v33, %v284_v29 }
 0x3f4   :  { %307 = vmax.xlane.f32.xlu0 %v306_v31  ;;  %v898_v32 = vpop.f32.mrf.mxu1 }
 0x3f5   :  { %v298_v34 = vadd.f32 %v290_v28, %v282_v30  ;;  %v285_v38 = vmul.f32 0.35355338, %v898_v32  ;;  %v321_v45 = vsel %vm302_vm3, %v300_v41, -inf }
 0x3f6   :  { %v266_v35 = vpop.f32.mrf.mxu1 }
 0x3f7   :  { %v283_v39 = vmul.f32 0.35355338, %v266_v35  ;;  %v315_v40 = vsel %vm302_vm3, %v298_v34, -inf  ;;  %v301_v47 = vadd.f32 %v293_v42, %v285_v38 }
 0x3f8   :  { %313 = vmax.xlane.f32.xlu0 %v312_v36  ;;  %316 = vmax.xlane.f32.xlu1 %v315_v40 }
 0x3f9   :  { %v299_v44 = vadd.f32 %v291_v37, %v283_v39  ;;  %v324_v48 = vsel %vm302_vm3, %v301_v47, -inf }
 0x3fb   :  { %v318_v46 = vsel %vm302_vm3, %v299_v44, -inf }
 0x3fc   :  { %322 = vmax.xlane.f32.xlu1 %v321_v45  ;;  %319 = vmax.xlane.f32.xlu0 %v318_v46 }
 0x400   :  { %325 = vmax.xlane.f32.xlu0 %v324_v48 }
 0x40d   :  { %401 = vrot.lane.b32.xlu1 %v1221_v52, %s1134_s28 }
 0x477   :  { %v311_v49 = vpop.xlane.xlu0 %310 }
 0x478   :  { %v329_v50 = vsub.f32 %v296_v9, %v311_v49 }
 0x479   :  { %v305_v53 = vpop.xlane.xlu1 %304 }
 0x47a   :  { %v339_v54 = vmul.f32 1.442695, %v329_v50  ;;  %v327_v55 = vsub.f32 %v294_v12, %v305_v53 }
 0x47c   :  { %1018 = vpow2.f32 %v339_v54  ;;  %v335_v57 = vmul.f32 1.442695, %v327_v55 }
 0x47d   :  { %v308_v58 = vpop.xlane.xlu0 %307 }
 0x47e   :  { %1020 = vpow2.f32 %v335_v57  ;;  %v328_v59 = vsub.f32 %v295_v23, %v308_v58 }
 0x480   :  { %v337_v63 = vmul.f32 1.442695, %v328_v59 }
 0x481   :  { %v314_v60 = vpop.xlane.xlu0 %313  ;;  %v317_v61 = vpop.xlane.xlu1 %316 }
 0x482   :  { %v330_v62 = vsub.f32 %v297_v27, %v314_v60  ;;  %v331_v3 = vsub.f32 %v298_v34, %v317_v61 }
 0x484   :  { %v341_v2 = vmul.f32 1.442695, %v330_v62  ;;  %v343_v6 = vmul.f32 1.442695, %v331_v3 }
 0x485   :  { %v323_v4 = vpop.xlane.xlu1 %322  ;;  %v320_v5 = vpop.xlane.xlu0 %319 }
 0x486   :  { %1022 = vpow2.f32 %v341_v2  ;;  %v333_v52 = vsub.f32 %v300_v41, %v323_v4  ;;  %v332_v8 = vsub.f32 %v299_v44, %v320_v5 }
 0x487   :  { %1024 = vpow2.f32 %v337_v63 }
 0x488   :  { %v347_v7 = vmul.f32 1.442695, %v333_v52  ;;  %v345_v18 = vmul.f32 1.442695, %v332_v8 }
 0x489   :  { %v1280_v9 = vpop.eup %1018  ;;  %v402_v10 = vpop.permute.xlu1 %401 }
 0x48a   :  { %v326_v11 = vpop.xlane.xlu0 %325  ;;  %1026 = vpow2.f32 %v347_v7  ;;  %899 = vmatprep.subr.bf16.mxu0 %v402_v10  ;;  %v357_v13 = vsel %vm302_vm3, %v1280_v9, 0.0 }
 0x48b   :  { %v334_v12 = vsub.f32 %v301_v47, %v326_v11  ;;  %v1021_v17 = vpop.eup %1020  ;;  %358 = vadd.xlane.f32.xlu1 %v357_v13  ;;  %900 = vmatpush3.bf16.msra.mxu0 %v402_v10  ;;  %1028 = vpow2.f32 %v343_v6 }
 0x48c   :  { %v351_v20 = vsel %vm302_vm3, %v1021_v17, 0.0 }
 0x48d   :  { %v349_v19 = vmul.f32 1.442695, %v334_v12 }
 0x48f   :  { %1030 = vpow2.f32 %v349_v19  ;;  %352 = vadd.xlane.f32.xlu1 %v351_v20 }
 0x490   :  { %1032 = vpow2.f32 %v345_v18 }
 0x493   :  { %v1023_v21 = vpop.eup %1022 }
 0x494   :  { %v360_v22 = vsel %vm302_vm3, %v1023_v21, 0.0  ;;  %v1025_v23 = vpop.eup %1024 }
 0x495   :  { %361 = vadd.xlane.f32.xlu0 %v360_v22  ;;  %v354_v28 = vsel %vm302_vm3, %v1025_v23, 0.0 }
 0x497   :  { %v1286_v25 = vpop.eup %1026 }
 0x498   :  { %v369_v27 = vsel %vm302_vm3, %v1286_v25, 0.0  ;;  %v1029_v29 = vpop.eup %1028 }
 0x499   :  { %370 = vadd.xlane.f32.xlu1 %v369_v27  ;;  %355 = vadd.xlane.f32.xlu0 %v354_v28  ;;  %v363_v31 = vsel %vm302_vm3, %v1029_v29, 0.0 }
 0x49c   :  { %v1031_v30 = vpop.eup %1030 }
 0x49d   :  { %v372_v32 = vsel %vm302_vm3, %v1031_v30, 0.0  ;;  %v1033_v33 = vpop.eup %1032  ;;  %364 = vadd.xlane.f32.xlu1 %v363_v31 }
 0x49e   :  { %373 = vadd.xlane.f32.xlu0 %v372_v32  ;;  %v366_v34 = vsel %vm302_vm3, %v1033_v33, 0.0 }
 0x4a2   :  { %367 = vadd.xlane.f32.xlu0 %v366_v34 }
 0x4ae   :  { %397 = vrot.lane.b32.xlu1 %v1225_v56, %s1134_s28 }
 0x4b2   :  { %395 = vrot.lane.b32.xlu1 %v1215_v43, %s1134_s28 }
 0x4b6   :  { %523 = vrot.lane.b32.xlu1 %v1196_v14, %s1135_s1 }
 0x4b8   :  { %399 = vrot.lane.b32.xlu0 %v1219_v51, %s1134_s28 }
 0x514   :  { %v359_v35 = vpop.xlane.xlu1 %358 }
 0x518   :  { %v353_v36 = vpop.xlane.xlu1 %352 }
 0x519   :  { %1034 = vrcp.f32 %v353_v36 }
 0x51e   :  { %v362_v37 = vpop.xlane.xlu0 %361 }
 0x522   :  { %v371_v38 = vpop.xlane.xlu1 %370  ;;  %v356_v39 = vpop.xlane.xlu0 %355 }
 0x523   :  { %1036 = vrcp.f32 %v356_v39 }
 0x524   :  { %1038 = vrcp.f32 %v362_v37  ;;  %v1005_v37 = vld [vmem:[#allocation2 + $0x4] ss:$8 sps:$4 sm:$0xff]  }
 0x525   :  { %1040 = vrcp.f32 %v359_v35  ;;  %v1002_v35 = vld [vmem:[#allocation2 + $0x14] ss:$8 sps:$4 sm:$0xff]  }
 0x526   :  { %v365_v40 = vpop.xlane.xlu1 %364  ;;  %v1035_v44 = vpop.eup %1034 }
 0x527   :  { %v374_v41 = vpop.xlane.xlu0 %373  ;;  %1042 = vrcp.f32 %v365_v40  ;;  %v383_v46 = vmul.f32 %v1035_v44, %v1021_v17 }
 0x52a   :  { %v398_v56 = vpop.permute.xlu1 %397 }
 0x52b   :  { %v368_v42 = vpop.xlane.xlu0 %367 }
 0x52c   :  { %1044 = vrcp.f32 %v368_v42 }
 0x52d   :  { %1046 = vrcp.f32 %v374_v41 }
 0x52e   :  { %1048 = vrcp.f32 %v371_v38  ;;  %v396_v49 = vpop.permute.xlu1 %395  ;;  %v519_v38 = vsub.s32 4, %v1206_v24 }
 0x52f   :  { %v400_v43 = vpop.permute.xlu0 %399 }
 0x530   :  { %901 = vmatprep.subr.bf16.mxu0 %v400_v43  ;;  %v1037_v51 = vpop.eup %1036  ;;  %v520_v39 = vrot.slane %v1209_v26, %v519_v38 }
 0x531   :  { %902 = vmatpush3.bf16.msra.mxu0 %v400_v43  ;;  %v1039_v45 = vpop.eup %1038  ;;  %v384_v47 = vmul.f32 %v1037_v51, %v1025_v23 }
 0x532   :  { %903 = vmatprep.subr.bf16.mxu0 %v398_v56  ;;  %v1041_v48 = vpop.eup %1040  ;;  %v386_v53 = vmul.f32 %v1039_v45, %v1023_v21  ;;  %v524_v52 = vpop.permute.xlu1 %523 }
 0x533   :  { %v391_v50 = vpack.c.bf16 %v384_v47, %v383_v46  ;;  %v385_v55 = vmul.f32 %v1041_v48, %v1280_v9 }
 0x534   :  { %v1043_v54 = vpop.eup %1042 }
 0x535   :  { %904 = vmatpush3.bf16.msra.mxu0 %v398_v56  ;;  %907 = vmatprep.mubr.msk.bf16.mxu0 %vm302_vm3, %v391_v50  ;;  %v392_v58 = vpack.c.bf16 %v386_v53, %v385_v55  ;;  %v387_v59 = vmul.f32 %v1043_v54, %v1029_v29 }
 0x536   :  { %905 = vmatprep.subr.bf16.mxu0 %v396_v49 }
 0x539   :  { %v1045_v57 = vpop.eup %1044  ;;  %906 = vmatpush3.bf16.msra.mxu0 %v396_v49 }
 0x53a   :  { %v388_v60 = vmul.f32 %v1045_v57, %v1033_v33  ;;  %915 = vmatprep.subr.bf16.mxu0 %v1128_v15  ;;  %v1047_v61 = vpop.eup %1046 }
 0x53b   :  { %v1049_v63 = vpop.eup %1048  ;;  %v390_v2 = vmul.f32 %v1047_v61, %v1031_v30 }
 0x53c   :  { %908 = vmatmul.mubr.msk.bf16.vlgmr.msra.gmra.mxu0 %vm302_vm3, %v392_v58  ;;  %v393_v62 = vpack.c.bf16 %v388_v60, %v387_v59  ;;  %v389_v3 = vmul.f32 %v1049_v63, %v1286_v25 }
 0x53d   :  { %916 = vmatpush3.bf16.msra.mxu0 %v524_v52 }
 0x53e   :  { %911 = vmatprep.mubr.msk.bf16.mxu0 %vm302_vm3, %v393_v62  ;;  %v394_v4 = vpack.c.bf16 %v390_v2, %v389_v3  ;;  %917 = vmatprep.subr.bf16.mxu0 %v1128_v15  ;;  %v601_v3 = vsub.s32 2, %v1206_v24 }
 0x540   :  { %v602_v52 = vrot.slane %v1209_v26, %v601_v3 }
 0x544   :  { %912 = vmatmul.mubr.msk.bf16.gmra.mxu0 %vm302_vm3, %v394_v4 }
 0x545   :  { %919 = vmatprep.mubr.msk.bf16.mxu0 %vm1129_vm1, %v1128_v15 }
 0x5fc   :  { %v909_v5 = vpop.f32.mrf.mxu0 }
 0x5fe   :  { %v453_v6 = vpop.f32.mrf.mxu0 }
 0x600   :  { %v910_v7 = vpop.f32.mrf.mxu0 }
 0x601   :  { %v985_v8 = vpack.i.bf16 %v910_v7, %v909_v5 }
 0x602   :  { %v456_v9 = vpop.f32.mrf.mxu0 }
 0x603   :  { %986 = vrot.lane.b32.xlu0 %v985_v8, %s1126_s22 }
 0x604   :  { %v913_v10 = vpop.f32.mrf.mxu0 }
 0x606   :  { %v469_v11 = vpop.f32.mrf.mxu0 }
 0x608   :  { %v914_v12 = vpop.f32.mrf.mxu0 }
 0x609   :  { %v990_v13 = vpack.i.bf16 %v914_v12, %v913_v10 }
 0x60a   :  { %v472_v17 = vpop.f32.mrf.mxu0 }
 0x60b   :  { %v995_v18 = vpack.i.bf16 %v472_v17, %v469_v11  ;;  %991 = vrot.lane.b32.xlu0 %v990_v13, %s1136_s29 }
 0x60d   :  { %996 = vrot.lane.b32.xlu1 %v995_v18, %s1137_s2  ;;  %v1006_v18 = vld [vmem:[%s1389_s3 + $0x38] sm:$0xff]  }
 0x60e   :  { %932 = vmatpush3.bf16.msra.mxu1 %v1006_v18 }
 0x60f   :  { %933 = vmatprep.subr.bf16.mxu1 %v1128_v15 }
 0x611   :  { %521 = vrot.lane.b32.xlu1 %v1202_v16, %s1135_s1 }
 0x675   :  { %v987_v14 = vpop.permute.xlu0 %986 }
 0x676   :  { %v989_v19 = vunpack.i.h.bf16 %v987_v14  ;;  %v988_v20 = vunpack.i.l.bf16 %v987_v14  ;;  %v1007_v14 = vld [vmem:[%s1389_s3 + $0x30] sm:$0xff]  }
 0x677   :  { %934 = vmatpush3.bf16.msra.mxu1 %v1007_v14 }
 0x678   :  { %v508_v27 = vsel %vm188_vm2, %v453_v6, %v988_v20  ;;  %v509_v28 = vsel %vm188_vm2, %v456_v9, %v989_v19  ;;  %v607_v6 = vsub.s32 3, %v1206_v24  ;;  %935 = vmatprep.subr.bf16.mxu1 %v1128_v15  ;;  %v1008_v19 = vld [vmem:[%s1389_s3 + $0x28] sm:$0xff]   ;;  %v1009_v20 = vld [vmem:[%s1389_s3 + $0x20] sm:$0xff]  }
 0x67a   :  { %v608_v10 = vrot.slane %v1209_v26, %v607_v6 }
 0x67b   :  { %936 = vmatpush3.bf16.msra.mxu1 %v1008_v19 }
 0x67c   :  { %937 = vmatprep.subr.bf16.mxu1 %v1128_v15 }
 0x67d   :  { %v992_v21 = vpop.permute.xlu0 %991 }
 0x67e   :  { %v994_v29 = vunpack.i.h.bf16 %v992_v21  ;;  %v993_v30 = vunpack.i.l.bf16 %v992_v21  ;;  %v1010_v21 = vld [vmem:[%s1389_s3 + $0x18] sm:$0xff]  }
 0x67f   :  { %v997_v22 = vpop.permute.xlu1 %996  ;;  %938 = vmatpush3.bf16.msra.mxu1 %v1009_v20 }
 0x680   :  { %v999_v23 = vunpack.i.h.bf16 %v997_v22  ;;  %v998_v25 = vunpack.i.l.bf16 %v997_v22  ;;  %939 = vmatprep.subr.bf16.mxu1 %v1128_v15  ;;  %v1011_v22 = vld [vmem:[%s1389_s3 + $0x10] sm:$0xff]  }
 0x682   :  { %v512_v31 = vsel %vm510_vm4, %v509_v28, %v999_v23  ;;  %v511_v32 = vsel %vm510_vm4, %v508_v27, %v998_v25  ;;  %v1012_v23 = vld [vmem:[%s1389_s3 + $0x8] sm:$0xff]   ;;  %v1013_v25 = vld [vmem:[%s1389_s3] sm:$0xff]   ;;  %v614_v27 = vsub.s32 6, %v1206_v24  ;;  %s1138_s3 = smov [#allocation7]  }
 0x683   :  { %v515_v33 = vsel %vm513_vm5, %v512_v31, %v994_v29  ;;  %v514_v34 = vsel %vm513_vm5, %v511_v32, %v993_v30  ;;  %v522_v16 = vpop.permute.xlu1 %521  ;;  %940 = vmatpush3.bf16.msra.mxu1 %v1010_v21  ;;  %s805_s19 = sshll.u32 %s1138_s3, 4  ;;  %s806_s19 = int_to_ptr.vmem [resolvable:$true] %s805_s19 }
 0x684   :  { %v516_v36 = vpack.c.bf16 %v515_v33, %v514_v34  ;;  %918 = vmatpush3.bf16.msra.mxu0 %v522_v16  ;;  %941 = vmatprep.subr.bf16.mxu1 %v1128_v15  ;;  %v615_v28 = vrot.slane %v1209_v26, %v614_v27  ;;  %s1098_s20 = scalar_lea.vmem %s806_s19, 256  ;;  %p1103_p11 = scmp.lt.s32.totalorder %s806_s19, %s806_s19 }
 0x685   :  { %923 = vmatprep.subr.bf16.mxu0 %v1128_v15  ;;  %p1099_p10 = scmp.ne.s32.totalorder %s806_s19, %s1098_s20  ;;  %p1104_p12 = scmp.lt.s32.totalorder %s1098_s20, %s1098_s20 }
 0x687   :  { %920 = vmatmul.mubr.msk.bf16.vlgmr.msra.gmra.mxu0 %vm55_vm0, %v516_v36  ;;  %942 = vmatpush3.bf16.msra.mxu1 %v1011_v22  ;;  %p1105_p13 = por %p1104_p12, %p1103_p11 }
 0x688   :  { %924 = vmatpush3.bf16.msra.mxu0 %v1002_v35  ;;  %927 = vmatprep.mubr.msk.bf16.mxu0 %vm1129_vm1, %v1128_v15 }
 0x689   :  { %925 = vmatprep.subr.bf16.mxu0 %v1128_v15  ;;  %943 = vmatprep.subr.bf16.mxu1 %v1128_v15  ;;  %p1106_p0 = pnand %p1105_p13, %p1099_p10 }
 0x68b   :  { %944 = vmatpush3.bf16.msra.mxu1 %v1012_v23 }
 0x68c   :  { %926 = vmatpush3.bf16.msra.mxu0 %v1005_v37  ;;  %945 = vmatprep.subr.bf16.mxu1 %v1128_v15 }
 0x68f   :  { %946 = vmatpush3.bf16.msra.mxu1 %v1013_v25 }
 0x747   :  { %v564_v40 = vpop.f32.mrf.mxu0 }
 0x748   :  { %v565_v41 = vadd.f32 %v564_v40, %v520_v39 }
 0x749   :  { %v921_v42 = vpop.f32.mrf.mxu0 }
 0x74a   :  { %v1323_v56 = vadd.f32 %v565_v41, %v1181_v0 }
 0x74b   :  { %v567_v43 = vpop.f32.mrf.mxu0 }
 0x74c   :  { %v568_v44 = vadd.f32 %v567_v43, %v520_v39  ;;  %v573_v51 = vsel %vm55_vm0, %v1323_v56, 0.0 }
 0x74d   :  { %574 = vadd.xlane.f32.xlu0 %v573_v51  ;;  %v922_v45 = vpop.f32.mrf.mxu0 }
 0x74e   :  { %v1328_v46 = vadd.f32 %v568_v44, %v1186_v1 }
 0x750   :  { %v576_v47 = vsel %vm55_vm0, %v1328_v46, 0.0 }
 0x751   :  { %577 = vadd.xlane.f32.xlu1 %v576_v47 }
 0x7d6   :  { %v575_v48 = vpop.xlane.xlu0 %574 }
 0x7d7   :  { %v579_v49 = vmul.f32 0.03125, %v575_v48 }
 0x7d9   :  { %v581_v50 = vsub.f32 %v1323_v56, %v579_v49 }
 0x7da   :  { %v578_v0 = vpop.xlane.xlu1 %577 }
 0x7db   :  { %v580_v53 = vmul.f32 0.03125, %v578_v0  ;;  %v583_v54 = vmul.f32 %v581_v50, %v581_v50 }
 0x7dd   :  { %v582_v55 = vsub.f32 %v1328_v46, %v580_v53  ;;  %v585_v57 = vsel %vm55_vm0, %v583_v54, 0.0  ;;  %v705_v53 = vsub.s32 5, %v1206_v24 }
 0x7de   :  { %586 = vadd.xlane.f32.xlu0 %v585_v57 }
 0x7df   :  { %v584_v58 = vmul.f32 %v582_v55, %v582_v55  ;;  %v706_v54 = vrot.slane %v1209_v26, %v705_v53 }
 0x7e1   :  { %v588_v1 = vsel %vm55_vm0, %v584_v58, 0.0 }
 0x7e2   :  { %589 = vadd.xlane.f32.xlu0 %v588_v1 }
 0x867   :  { %v587_v59 = vpop.xlane.xlu0 %586 }
 0x868   :  { %v591_v60 = vmul.f32 0.03125, %v587_v59 }
 0x86a   :  { %v593_v61 = vadd.f32 1e-05, %v591_v60 }
 0x86b   :  { %v590_v62 = vpop.xlane.xlu0 %589 }
 0x86c   :  { %1050 = vrsqrt.f32 %v593_v61  ;;  %v592_v63 = vmul.f32 0.03125, %v590_v62 }
 0x86e   :  { %v594_v2 = vadd.f32 1e-05, %v592_v63 }
 0x870   :  { %1052 = vrsqrt.f32 %v594_v2 }
 0x879   :  { %v1051_v4 = vpop.eup %1050 }
 0x87a   :  { %v597_v5 = vmul.f32 %v1051_v4, %v581_v50 }
 0x87c   :  { %v603_v9 = vmul.f32 %v602_v52, %v597_v5 }
 0x87d   :  { %v1053_v7 = vpop.eup %1052 }
 0x87e   :  { %v598_v8 = vmul.f32 %v1053_v7, %v582_v55  ;;  %v609_v12 = vadd.f32 %v608_v10, %v603_v9 }
 0x880   :  { %v604_v11 = vmul.f32 %v602_v52, %v598_v8 }
 0x882   :  { %v610_v13 = vadd.f32 %v608_v10, %v604_v11 }
 0x884   :  { %v611_v17 = vpack.c.bf16 %v610_v13, %v609_v12 }
 0x886   :  { %928 = vmatmul.mubr.msk.bf16.vlgmr.msra.gmra.mxu0 %vm55_vm0, %v611_v17 }
 0x946   :  { %v661_v29 = vpop.f32.mrf.mxu0 }
 0x947   :  { %v662_v30 = vadd.f32 %v661_v29, %v615_v28 }
 0x948   :  { %v929_v31 = vpop.f32.mrf.mxu0 }
 0x949   :  { %v670_v32 = vmul.f32 0.044715, %v662_v30  ;;  %v668_v45 = vmul.f32 0.5, %v662_v30 }
 0x94a   :  { %v664_v33 = vpop.f32.mrf.mxu0 }
 0x94b   :  { %v672_v34 = vmul.f32 %v670_v32, %v662_v30  ;;  %v665_v16 = vadd.f32 %v664_v33, %v615_v28 }
 0x94c   :  { %v930_v35 = vpop.f32.mrf.mxu0 }
 0x94d   :  { %v674_v36 = vmul.f32 %v672_v34, %v662_v30  ;;  %v671_v37 = vmul.f32 0.044715, %v665_v16  ;;  %v669_v47 = vmul.f32 0.5, %v665_v16 }
 0x94f   :  { %v676_v38 = vadd.f32 %v674_v36, %v662_v30  ;;  %v673_v39 = vmul.f32 %v671_v37, %v665_v16 }
 0x951   :  { %v678_v40 = vmul.f32 0.7978846, %v676_v38  ;;  %v675_v41 = vmul.f32 %v673_v39, %v665_v16 }
 0x953   :  { %1054 = vtanh.f32 %v678_v40  ;;  %v677_v15 = vadd.f32 %v675_v41, %v665_v16 }
 0x955   :  { %v679_v42 = vmul.f32 0.7978846, %v677_v15 }
 0x957   :  { %1056 = vtanh.f32 %v679_v42 }
 0x960   :  { %v1055_v43 = vpop.eup %1054 }
 0x961   :  { %v682_v44 = vadd.f32 1.0, %v1055_v43 }
 0x963   :  { %v684_v49 = vmul.f32 %v682_v44, %v668_v45 }
 0x964   :  { %v1057_v51 = vpop.eup %1056 }
 0x965   :  { %v683_v48 = vadd.f32 1.0, %v1057_v51 }
 0x967   :  { %v685_v50 = vmul.f32 %v683_v48, %v669_v47 }
 0x969   :  { %v686_v0 = vpack.c.bf16 %v685_v50, %v684_v49 }
 0x96b   :  { %948 = vmatmul.mubr.bf16.vlgmr.msra.gmra.mxu1 %v686_v0 }
 0xa2b   :  { %v789_v55 = vpop.f32.mrf.mxu1 }
 0xa2c   :  { %v790_v57 = vadd.f32 %v789_v55, %v706_v54 }
 0xa2d   :  { %v949_v58 = vpop.f32.mrf.mxu1 }
 0xa2e   :  { %v796_v1 = vadd.f32 %v790_v57, %v1323_v56 }
 0xa2f   :  { %v792_v59 = vpop.f32.mrf.mxu1 }
 0xa30   :  { %798 = vst.msk [vmem:[#allocation7] sm:$0xff] %vm55_vm0, %v796_v1  ;;  %v793_v60 = vadd.f32 %v792_v59, %v706_v54 }
 0xa31   :  { %v950_v61 = vpop.f32.mrf.mxu1 }
 0xa32   :  { %v797_v62 = vadd.f32 %v793_v60, %v1328_v46 }
 0xa34   :  { %799 = vst.msk [vmem:[#allocation7 + $0x8] sm:$0xff] %vm55_vm0, %v797_v62 }
 0xa35   :  { %1109 = shalt.err (!%p1106_p0)
}
 0xa36   :  { %811 = dma.vmem_to_hbm [thread:$0]  %s806_s19, 256, %s1391_s5, [#allocation4], %s1125_s21, %s1125_s21, %s1126_s22  }
 0xa37   :  { %1122 = dma.done.wait [#allocation4], 256  }
 0xa38   :  { %1123 = vsyncadd [#allocation4], 4294967040 }
 0xa39   :  { %815 = vsyncpa [#allocation3], 1 }
 0xa3a   :  { %816 = vsyncpa [#allocation6], 1 }
 0xa3b   :  { %817 = vsyncpa [#allocation4], 1 }

</bundles_post_ra>
